<compile_context>
chip_gen: v5e
topology: v5e:2x2
jax: 0.10.0
libtpu: 0.0.40
codegen_flags: <defaults>
</compile_context>

<pallas_src>
import functools

import jax
import jax.numpy as jnp
from jax.experimental import pallas as pl
from jax.experimental.pallas import tpu as pltpu


def _round_up(a, b):
    return (a + b - 1) // b * b


# --------------------------------------------------------------------------- #
# Kernel
# --------------------------------------------------------------------------- #
def _fused_mlp_kernel(x_ref, w_ref, b_ref, o_ref, cur_ref, nxt_ref, *,
                      tn, gov_scale):
    """One grid step: layer `l`, output-column block `j`.

    Grid = (L, nb).  Full-K weight blocks => no reduction axis, no accumulator.
      x_ref  : (M, Kp)        resident bf16 network input (DMA'd once)
      w_ref  : (1, 1, Kp, tn) contiguous bf16 full-K weight block of layer l
      b_ref  : (1, 1, tn)     f32 bias block of layer l
      o_ref  : (M, tn)        f32 output block (final value written at l==L-1)
      cur_ref: (M, Kp)        bf16 activation input of the current layer
      nxt_ref: (M, Kp)        bf16 staging buffer for the next layer's input
    """
    l = pl.program_id(0)                      # layer index (outer, sequential)
    j = pl.program_id(1)                      # output-column block (inner)
    last_layer = pl.num_programs(0) - 1
    last_block = pl.num_programs(1) - 1

    # Seed the resident activation buffer with the network input, once.
    @pl.when(jnp.logical_and(l == 0, j == 0))
    def _():
        cur_ref[...] = x_ref[...]

    # Full-K matmul for this layer's column block: (M, Kp) @ (Kp, tn) on MXU,
    # f32 accumulation.
    y = jnp.dot(cur_ref[...], w_ref[0, 0],
                preferred_element_type=jnp.float32)
    y = jnp.maximum(y + b_ref[0], 0.0)        # bias + ReLU (f32)

    # Stage next layer's input columns [j*tn, (j+1)*tn) as bf16.
    col = pl.multiple_of(j * tn, tn)
    nxt_ref[:, pl.ds(col, tn)] = y.astype(nxt_ref.dtype)

    # Output tile.  The 0.05 governor applies only to the final layer (after
    # the ReLU, exactly like the module); earlier layers' writes to the same
    # HBM block are simply overwritten by the last layer.
    scale = jnp.where(l == last_layer, gov_scale, 1.0)
    o_ref[...] = (y * scale).astype(o_ref.dtype)

    # Layer finished: publish its activations as the next layer's input.
    @pl.when(j == last_block)
    def _():
        cur_ref[...] = nxt_ref[...]


# --------------------------------------------------------------------------- #
# Wrapper
# --------------------------------------------------------------------------- #
def mlp_forward_fused(x, w_all, b_all, *, dim, dim_pad, tn, gov_scale,
                      vmem_limit_bytes):
    """Fused 10-layer  scale * relu(...relu(x @ W0 + b0)... @ W9 + b9)."""
    M = x.shape[0]
    L, nb, Kp, tn_ = w_all.shape
    assert Kp == dim_pad and tn_ == tn and nb * tn == dim_pad
    assert b_all.shape == (L, 1, dim_pad)

    # Cast + zero-pad the input once (padded lanes stay exactly zero).
    xp = jnp.zeros((M, dim_pad), jnp.bfloat16).at[:, :dim].set(
        x.astype(jnp.bfloat16))

    kernel = functools.partial(_fused_mlp_kernel, tn=tn,
                               gov_scale=float(gov_scale))

    out = pl.pallas_call(
        kernel,
        out_shape=jax.ShapeDtypeStruct((M, dim_pad), jnp.float32),
        grid_spec=pltpu.PrefetchScalarGridSpec(
            num_scalar_prefetch=0,
            grid=(L, nb),
            in_specs=[
                # network input: constant index map -> DMA'd once, resident
                pl.BlockSpec((M, Kp), lambda l, j: (0, 0)),
                # full-K weight block of layer l: one long contiguous DMA
                pl.BlockSpec((1, 1, Kp, tn), lambda l, j: (l, j, 0, 0)),
                # bias block of layer l
                pl.BlockSpec((1, 1, tn), lambda l, j: (l, 0, j)),
            ],
            out_specs=pl.BlockSpec((M, tn), lambda l, j: (0, j)),
            scratch_shapes=[
                pltpu.VMEM((M, Kp), jnp.bfloat16),   # cur activations
                pltpu.VMEM((M, Kp), jnp.bfloat16),   # nxt activations
            ],
        ),
        compiler_params=pltpu.CompilerParams(
            # Both axes carry dependencies (layer chain; activations shared
            # across column blocks) -> "arbitrary".
            dimension_semantics=("arbitrary", "arbitrary"),
            vmem_limit_bytes=int(vmem_limit_bytes),
        ),
    )(xp, w_all, b_all)
    return out[:, :dim]


# --------------------------------------------------------------------------- #
# Layout / parameter preparation
# --------------------------------------------------------------------------- #
def choose_layout(dim, weight_bytes=2):
    """Per-chip tile width tn, padded dim, and scoped-VMEM limit.

    Picks the largest lane-aligned tn whose double-buffered full-K bf16 weight
    block fits ~65% of VMEM (v5e/v6e 128 MiB -> tn=2048; v7x 64 MiB -> tn=1024
    at D=10000), without over-padding small dims.
    """
    try:
        vmem = int(pltpu.get_tpu_info().vmem_capacity_bytes)
    except Exception:
        vmem = 64 * 1024 * 1024  # conservative (v7x per-TensorCore VMEM)

    lane_dim = _round_up(dim, 128)
    budget = int(vmem * 0.65)
    tn = 128
    for cand in (2048, 1024, 512, 256, 128):
        if cand > lane_dim:
            continue
        dim_pad_c = _round_up(dim, cand)
        if 2 * dim_pad_c * cand * weight_bytes <= budget:
            tn = cand
            break
    dim_pad = _round_up(dim, tn)
    weight_db = 2 * dim_pad * tn * weight_bytes
    vmem_limit = max(32 << 20,
                     min(vmem - (6 << 20), weight_db + (16 << 20)))
    return tn, dim_pad, vmem_limit


def init_mlp_params(key, dim, num_layers):
    """PyTorch nn.Linear init: U(-1/sqrt(in), 1/sqrt(in)); W stored transposed."""
    params = []
    bound = 1.0 / float(dim) ** 0.5
    for _ in range(num_layers):
        kw, kb, key = jax.random.split(key, 3)
        w_t = jax.random.uniform(kw, (dim, dim), jnp.float32,
                                 minval=-bound, maxval=bound)
        b = jax.random.uniform(kb, (dim,), jnp.float32,
                               minval=-bound, maxval=bound)
        params.append((w_t, b))
    return params


def prepare_params(params, dim, dim_pad, tn, weight_dtype=jnp.bfloat16):
    """One-time prep: zero-pad to dim_pad, cast weights to bf16, pre-block to
    [L, nb, Kp, tn] so every full-K weight-block DMA is fully contiguous."""
    nb = dim_pad // tn
    w_blocks, b_rows = [], []
    for w_t, b in params:
        wp = jnp.zeros((dim_pad, dim_pad), weight_dtype)
        wp = wp.at[:dim, :dim].set(w_t.astype(weight_dtype))
        # [Kp, Np] -> [nb, Kp, tn]  (full-K blocks)
        w_blocks.append(wp.reshape(dim_pad, nb, tn).transpose(1, 0, 2))
        b_rows.append(jnp.zeros((1, dim_pad), jnp.float32).at[0, :dim].set(b))
    w_all = jnp.stack(w_blocks)          # [L, nb, Kp, tn]  bf16
    b_all = jnp.stack(b_rows)            # [L, 1, Np]       f32
    return w_all, b_all


# --------------------------------------------------------------------------- #
# Pure-JAX reference (same bf16-weight / bf16-activation / f32-accumulate math)
# --------------------------------------------------------------------------- #
def mlp_reference(x, params, gov_scale=0.05):
    h = x
    for w_t, b in params:
        y = jnp.dot(h.astype(jnp.bfloat16), w_t.astype(jnp.bfloat16),
                    preferred_element_type=jnp.float32) + b
        h = jnp.maximum(y, 0.0)
    return h * gov_scale


# --------------------------------------------------------------------------- #
# Demo
# --------------------------------------------------------------------------- #
if __name__ == "__main__":
    BATCH = 8
    DIM = 250          # spec uses 10000; small non-128-aligned dim exercises the
                       # same padding / blocking / fused-layer path
    NUM_LAYERS = 10
    GOV_SCALE = 0.05

    key = jax.random.PRNGKey(0)
    kx, kp = jax.random.split(key)
    x = jax.random.normal(kx, (BATCH, DIM), jnp.float32)
    params = init_mlp_params(kp, DIM, NUM_LAYERS)

    tn, dim_pad, vmem_limit = choose_layout(DIM)
    w_all, b_all = prepare_params(params, DIM, dim_pad, tn)

    out = mlp_forward_fused(x, w_all, b_all, dim=DIM, dim_pad=dim_pad, tn=tn,
                            gov_scale=GOV_SCALE, vmem_limit_bytes=vmem_limit)
    out = jax.block_until_ready(out)

    ref = mlp_reference(x, params, GOV_SCALE)
    assert out.shape == (BATCH, DIM)
    rel_err = float(jnp.max(jnp.abs(out - ref)) /
                    (jnp.max(jnp.abs(ref)) + 1e-12))
    assert rel_err < 5e-2, f"mismatch vs reference: rel_err={rel_err}"

    print("KERNEL_OK")
</pallas_src>

<mosaic_0001>
module attributes {stable_mosaic.version = 11 : i64} {
  func.func @_fused_mlp_kernel(%arg0: i32, %arg1: i32, %arg2: memref<8x256xbf16, #tpu.memory_space<vmem>>, %arg3: memref<1x1x256x256xbf16, #tpu.memory_space<vmem>>, %arg4: memref<1x1x256xf32, #tpu.memory_space<vmem>>, %arg5: memref<8x256xf32, #tpu.memory_space<vmem>>, %arg6: memref<8x256xbf16, #tpu.memory_space<vmem>>, %arg7: memref<8x256xbf16, #tpu.memory_space<vmem>>) attributes {dimension_semantics = [#tpu.dimension_semantics<arbitrary>, #tpu.dimension_semantics<arbitrary>], iteration_bounds = array<i64: 10, 1>, scalar_prefetch = 0 : i64, scratch_operands = 2 : i64, tpu.core_type = #tpu.core_type<tc>, window_params = [{pipeline_mode = #tpu.pipeline_mode<synchronous>, transform_indices = @transform_0, window_bounds = array<i64: 8, 256>}, {transform_indices = @transform_1, window_bounds = array<i64: 1, 1, 256, 256>}, {transform_indices = @transform_2, window_bounds = array<i64: 1, 1, 256>}, {transform_indices = @transform_3, window_bounds = array<i64: 8, 256>}]} {
    %c0_i32 = arith.constant 0 : i32
    %0 = arith.cmpi eq, %arg0, %c0_i32 : i32
    %c0_i32_0 = arith.constant 0 : i32
    %1 = arith.cmpi eq, %arg1, %c0_i32_0 : i32
    %2 = arith.andi %0, %1 : i1
    %3 = arith.extui %2 : i1 to i32
    %c0_i32_1 = arith.constant 0 : i32
    %4 = arith.cmpi ne, %3, %c0_i32_1 : i32
    scf.if %4 {
      %c0_18 = arith.constant 0 : index
      %c0_19 = arith.constant 0 : index
      %28 = vector.load %arg2[%c0_18, %c0_19] : memref<8x256xbf16, #tpu.memory_space<vmem>>, vector<8x256xbf16>
      %c0_20 = arith.constant 0 : index
      %c0_21 = arith.constant 0 : index
      %29 = vector.load %arg6[%c0_20, %c0_21] : memref<8x256xbf16, #tpu.memory_space<vmem>>, vector<8x256xbf16>
      tpu.vector_store %arg6[%c0_20, %c0_21], %28 {strides = array<i32>} : memref<8x256xbf16, #tpu.memory_space<vmem>>, vector<8x256xbf16>,
    } else {
    }
    %c0 = arith.constant 0 : index
    %c0_2 = arith.constant 0 : index
    %5 = vector.load %arg6[%c0, %c0_2] : memref<8x256xbf16, #tpu.memory_space<vmem>>, vector<8x256xbf16>
    %c0_3 = arith.constant 0 : index
    %c0_4 = arith.constant 0 : index
    %c0_5 = arith.constant 0 : index
    %c0_6 = arith.constant 0 : index
    %6 = vector.load %arg3[%c0_3, %c0_4, %c0_5, %c0_6] : memref<1x1x256x256xbf16, #tpu.memory_space<vmem>>, vector<1x1x256x256xbf16>
    %7 = vector.shape_cast %6 : vector<1x1x256x256xbf16> to vector<256x256xbf16>
    %cst = arith.constant dense<0.000000e+00> : vector<8x256xf32>
    %8 = tpu.matmul %5, %7, %cst {dimension_numbers = #tpu.dot_dimension_numbers<[1], [0], [0], [1], [0, 0, 1, 1], [], []>} : vector<8x256xbf16>, vector<256x256xbf16>, vector<8x256xf32> -> vector<8x256xf32>
    %c0_7 = arith.constant 0 : index
    %c0_8 = arith.constant 0 : index
    %c0_9 = arith.constant 0 : index
    %9 = vector.load %arg4[%c0_7, %c0_8, %c0_9] : memref<1x1x256xf32, #tpu.memory_space<vmem>>, vector<1x1x256xf32>
    %10 = vector.shape_cast %9 : vector<1x1x256xf32> to vector<1x256xf32>
    %11 = vector.broadcast %10 : vector<1x256xf32> to vector<8x256xf32>
    %12 = arith.addf %8, %11 : vector<8x256xf32>
    %cst_10 = arith.constant 0.000000e+00 : f32
    %13 = vector.broadcast %cst_10 : f32 to vector<8x256xf32>
    %14 = arith.maximumf %12, %13 : vector<8x256xf32>
    %c256_i32 = arith.constant 256 : i32
    %15 = arith.muli %arg1, %c256_i32 : i32
    %16 = tpu.assume_multiple %15, 256 : i32
    %17 = arith.truncf %14 : vector<8x256xf32> to vector<8x256xbf16>
    %c0_11 = arith.constant 0 : index
    %18 = arith.index_cast %16 : i32 to index
    %19 = vector.load %arg7[%c0_11, %18] : memref<8x256xbf16, #tpu.memory_space<vmem>>, vector<8x256xbf16>
    tpu.vector_store %arg7[%c0_11, %18], %17 {strides = array<i32>} : memref<8x256xbf16, #tpu.memory_space<vmem>>, vector<8x256xbf16>,
    %c9_i32 = arith.constant 9 : i32
    %20 = arith.cmpi eq, %arg0, %c9_i32 : i32
    %cst_12 = arith.constant 5.000000e-02 : f32
    %cst_13 = arith.constant 1.000000e+00 : f32
    %21 = arith.select %20, %cst_12, %cst_13 : f32
    %22 = vector.broadcast %21 : f32 to vector<8x256xf32>
    %23 = arith.mulf %14, %22 : vector<8x256xf32>
    %c0_14 = arith.constant 0 : index
    %c0_15 = arith.constant 0 : index
    %24 = vector.load %arg5[%c0_14, %c0_15] : memref<8x256xf32, #tpu.memory_space<vmem>>, vector<8x256xf32>
    tpu.vector_store %arg5[%c0_14, %c0_15], %23 {strides = array<i32>} : memref<8x256xf32, #tpu.memory_space<vmem>>, vector<8x256xf32>,
    %c0_i32_16 = arith.constant 0 : i32
    %25 = arith.cmpi eq, %arg1, %c0_i32_16 : i32
    %26 = arith.extui %25 : i1 to i32
    %c0_i32_17 = arith.constant 0 : i32
    %27 = arith.cmpi ne, %26, %c0_i32_17 : i32
    scf.if %27 {
      %c0_18 = arith.constant 0 : index
      %c0_19 = arith.constant 0 : index
      %28 = vector.load %arg7[%c0_18, %c0_19] : memref<8x256xbf16, #tpu.memory_space<vmem>>, vector<8x256xbf16>
      %c0_20 = arith.constant 0 : index
      %c0_21 = arith.constant 0 : index
      %29 = vector.load %arg6[%c0_20, %c0_21] : memref<8x256xbf16, #tpu.memory_space<vmem>>, vector<8x256xbf16>
      tpu.vector_store %arg6[%c0_20, %c0_21], %28 {strides = array<i32>} : memref<8x256xbf16, #tpu.memory_space<vmem>>, vector<8x256xbf16>,
    } else {
    }
    return
  }
  func.func @transform_0(%arg0: i32, %arg1: i32) -> (i32, i32) {
    %c0_i32 = arith.constant 0 : i32
    %c0_i32_0 = arith.constant 0 : i32
    %c0_i32_1 = arith.constant 0 : i32
    return %c0_i32, %c0_i32_0 : i32, i32
  }
  func.func @transform_1(%arg0: i32, %arg1: i32) -> (i32, i32, i32, i32) {
    %c0_i32 = arith.constant 0 : i32
    %c0_i32_0 = arith.constant 0 : i32
    %c0_i32_1 = arith.constant 0 : i32
    return %arg0, %arg1, %c0_i32, %c0_i32_0 : i32, i32, i32, i32
  }
  func.func @transform_2(%arg0: i32, %arg1: i32) -> (i32, i32, i32) {
    %c0_i32 = arith.constant 0 : i32
    %c0_i32_0 = arith.constant 0 : i32
    return %arg0, %c0_i32, %arg1 : i32, i32, i32
  }
  func.func @transform_3(%arg0: i32, %arg1: i32) -> (i32, i32) {
    %c0_i32 = arith.constant 0 : i32
    %c0_i32_0 = arith.constant 0 : i32
    return %c0_i32, %arg1 : i32, i32
  }
}

</mosaic_0001>

<bundles_post_ra>
// kernel: tpu_custom_call.1
= control target key start
LH: loop header
LB: loop body
LE: loop exit
PB: predicated region body
PF: predicated region fallthrough
CT: control target
= control target key end

     0   :  { %8 = vsyncpa [#allocation5], 0  ;;  %s1319_s0 = inlined_call_operand.hbm [shape: bf16[8,256], index: 0, kind: input, shape index: {}]   ;;  %s1320_s1 = inlined_call_operand.hbm [shape: bf16[10,1,256,256], index: 1, kind: input, shape index: {}]   ;;  %s1321_s2 = inlined_call_operand.hbm [shape: f32[10,1,256], index: 2, kind: input, shape index: {}]   ;;  %s1322_s3 = inlined_call_operand.hbm [shape: f32[8,256], index: 3, kind: output, shape index: {}]  }
   0x1   :  { %9 = vsyncpa [#allocation8], 0 }
   0x2   :  { %11 = vsyncpa [#allocation8 + $0x1], 0 }
   0x3   :  { %12 = vsyncpa [#allocation6], 0  ;;  %s1118_s12 = smov 0   ;;  %s1120_s13 = smov 0  }
   0x4   :  { %s1122_s14 = smov 0   ;;  %s1124_s15 = smov 0  }
   0x5   :  { %s1126_s16 = smov 0   ;;  %s1128_s17 = smov 0  }
   0x6 LB: > { %s30_s18 = sadd.s32 1, %s1088_s16  ;;  %s60_s19 = sadd.s32 1, %s1080_s14  ;;  %s1092_s17 = sphi %s1128_s17, %s18_s17   ;;  %s1088_s16 = sphi %s1126_s16, %s1331_s16   ;;  %s1084_s15 = sphi %s1124_s15, %s1330_s15   ;;  %s1080_s14 = sphi %s1122_s14, %s1329_s14   ;;  %s1076_s13 = sphi %s1120_s13, %s1328_s13   ;;  %s1072_s12 = sphi %s1118_s12, %s1327_s12  }
   0x7   : > { %p32_p0 = scmp.ge.s32.totalorder %s30_s18, 10  ;;  %p67_p1 = scmp.ne.s32.totalorder %s1080_s14, %s1076_s13 }
   0x8   : > { %p68_p2 = scmp.eq.s32.totalorder %s1092_s17, 0  ;;  %p860_p4 = scmp.lt.s32.totalorder %s1092_s17, 10 }
   0x9   : > { %s1333_s18 = smov (%p32_p0, %s30_s18), 0  ;;  %s163_s22 = sand.u32 1, %s1092_s17  }
   0xa   : > { %p1155_p3 = por %p68_p2, %p67_p1  ;;  %s55_s21 = ssub.s32 %s1088_s16, %s1333_s18 }
   0xb   : > { %p58_p5 = scmp.eq.s32.totalorder %s55_s21, 0  ;;  %s165_s23 = sand.u32 1, %s1080_s14  }
   0xc   : > { %s802_s24 = sshll.u32 %s1088_s16, 8  ;;  %s660_s26 = sshll.u32 %s165_s23, 8 }
   0xd   : > { %s1166_s25 = scalar_select %p58_p5, %s1080_s14, %s60_s19  }
   0xe   : > { %s174_s29 = scalar_lea.hbm %s1320_s1, %s802_s24  ;;  %s167_s4 = scalar_lea.vmem [#allocation7], %s660_s26 }
   0xf   : > { %s175_s30 = sshll.u32 %s174_s29, 4  ;;  %s177_s5 = sshll.u32 %s167_s4, 4  ;;  %s176_s30 = int_to_ptr.hbm [resolvable:$true] %s175_s30  ;;  %s178_s5 = int_to_ptr.vmem [resolvable:$true] %s177_s5 }
  0x10   : > { %p1175_p6 = pnand %p860_p4, %p1155_p3  ;;  %s164_s7 = scalar_lea.sflag [#allocation8], %s163_s22 }
  0x11   : > { %s1094_s8 = smov 128   ;;  %s1095_s9 = smov 8  }
  0x12   : > { %855 = dma.hbm_to_vmem [thread:$0]  (!%p1175_p6), %s176_s30, 4096, %s178_s5, %s164_s7, %s1094_s8, %s1094_s8, %s1095_s9  }
  0x13   : > { %s1182_s10 = sadd.s32 4294967295, %s1092_s17   ;;  %p73_p7 = scmp.ne.s32.totalorder %s1076_s13, %s1072_s12 }
  0x14   : > { %p74_p8 = scmp.eq.s32.totalorder %s1182_s10, 0  ;;  %p657_p9 = scmp.ge.s32.totalorder %s1092_s17, 1 }
  0x15   : > { %p138_p10 = scmp.lt.s32.totalorder %s1092_s17, 11  ;;  %s150_s22 = sshll.u32 %s1319_s0, 4  ;;  %s151_s22 = int_to_ptr.hbm [resolvable:$true] %s150_s22 }
  0x16   : > { %p1191_p11 = por %p74_p8, %p73_p7  ;;  %s1096_s12 = smov [#allocation4]  }
  0x17   : > { %p1195_p12 = pnand %p657_p9, %p138_p10  ;;  %s152_s24 = sshll.u32 %s1096_s12, 4  ;;  %s153_s24 = int_to_ptr.vmem [resolvable:$true] %s152_s24 }
  0x18   : > { %s663_s26 = sshll.u32 %s165_s23, 1  ;;  %s664_s27 = sshll.u32 %s1088_s16, 1 }
  0x19   : > { %p848_p13 = pneg %p1195_p12  ;;  %s191_s28 = scalar_lea.vmem [#allocation9], %s663_s26 }
  0x1a   : > { %s201_s29 = sshll.u32 %s191_s28, 4  ;;  %s197_s5 = scalar_lea.hbm %s1321_s2, %s664_s27  ;;  %s202_s29 = int_to_ptr.vmem [resolvable:$true] %s201_s29 }
  0x1b   : > { %p849_p0 = pnand %p848_p13, %p74_p8  ;;  %s199_s8 = sshll.u32 %s197_s5, 4  ;;  %s200_s8 = int_to_ptr.hbm [resolvable:$true] %s199_s8 }
  0x1c   : > { %858 = dma.hbm_to_vmem [thread:$0]  (!%p1175_p6), %s200_s8, 32, %s202_s29, %s164_s7  }
  0x1d   : > { %851 = dma.hbm_to_vmem [thread:$0]  (!%p849_p0), %s151_s22, 128, %s153_s24, [#allocation5]  }
  0x1e   : > { %210 = sbr.rel (%p1195_p12) target bundleno = 226 (0xe2), region = 32 }
  0x23   : > { %1059 = dma.done.wait (%p74_p8), [#allocation5], 128  }
  0x24   : > { %1061 = vsyncadd (%p74_p8), [#allocation5], 4294967168  ;;  %s217_s23 = sand.u32 1, %s1182_s10   ;;  %s219_s9 = sand.u32 1, %s1076_s13  }
  0x25   : > { %s667_s20 = sshll.u32 %s219_s9, 8  ;;  %s218_s21 = scalar_lea.sflag [#allocation8], %s217_s23 }
  0x26   : > { %s1220_s22 = scalar_lea.vmem [#allocation7], %s667_s20 }
  0x27   : > { %1063 = dma.done.wait (%p1191_p11), %s218_s21, 4128  }
  0x28   : > { %1065 = vsyncadd (%p1191_p11), %s218_s21, 4294963168  ;;  %s1226_s6 = sshll.u32 %s219_s9, 1  ;;  %p257_p1 = scmp.eq.s32.totalorder %s1084_s15, 0 }
  0x29   : > { %s231_s7 = scalar_lea.vmem [#allocation9], %s1226_s6  ;;  %v263_v0 = vld [vmem:[#allocation4] sm:$0xff] (%p257_p1) }
  0x2a   : > { %262 = sbr.rel (!%p257_p1) target bundleno = 47 (0x2f), region = 48  ;;  %264 = vst [vmem:[#allocation2] sm:$0xff] (%p257_p1), %v263_v0 }
  0x2f PF: > { %v728_v1 = vld [vmem:[%s1220_s22 + $0x70] sm:$0xf]  ;;  %v819_v2 = vld [vmem:[%s1220_s22 + $0x74] sm:$0xf0]  ;;  %v818_v6 = vld [vmem:[%s1220_s22 + $0x74] sm:$0xf] }
  0x30   : > { %v792_v3 = vld [vmem:[%s1220_s22 + $0xf0] sm:$0xf]  ;;  %v729_v4 = vor.u32 %v819_v2, %v728_v1  ;;  %v835_v5 = vld [vmem:[%s1220_s22 + $0xf4] sm:$0xf0]  ;;  %v730_v7 = vld [vmem:[%s1220_s22 + $0x78] sm:$0xf0] }
  0x31   : > { %v793_v8 = vor.u32 %v835_v5, %v792_v3  ;;  %v733_v9 = vor.u32 %v818_v6, %v730_v7  ;;  %v834_v10 = vld [vmem:[%s1220_s22 + $0xf4] sm:$0xf]  ;;  %v794_v11 = vld [vmem:[%s1220_s22 + $0xf8] sm:$0xf0]  ;;  %v720_v12 = vld [vmem:[%s1220_s22 + $0x60] sm:$0xf] }
  0x32   : > { %471 = vmatpush.bf16.msra.mxu0 %v729_v4  ;;  %v797_v13 = vor.u32 %v834_v10, %v794_v11  ;;  %v817_v14 = vld [vmem:[%s1220_s22 + $0x64] sm:$0xf0]  ;;  %v784_v15 = vld [vmem:[%s1220_s22 + $0xe0] sm:$0xf]  ;;  %v816_v19 = vld [vmem:[%s1220_s22 + $0x64] sm:$0xf] }
  0x33   : > { %v833_v16 = vld [vmem:[%s1220_s22 + $0xe4] sm:$0xf0]  ;;  %484 = vmatpush.bf16.msra.mxu1 %v793_v8  ;;  %497 = vmatpush.bf16.msra.mxu2 %v733_v9  ;;  %v721_v17 = vor.u32 %v817_v14, %v720_v12  ;;  %v722_v20 = vld [vmem:[%s1220_s22 + $0x68] sm:$0xf0]  ;;  %v832_v21 = vld [vmem:[%s1220_s22 + $0xe4] sm:$0xf] }
  0x34   : > { %v785_v18 = vor.u32 %v833_v16, %v784_v15  ;;  %510 = vmatpush.bf16.msra.mxu3 %v797_v13  ;;  %v725_v22 = vor.u32 %v816_v19, %v722_v20  ;;  %v786_v23 = vld [vmem:[%s1220_s22 + $0xe8] sm:$0xf0]  ;;  %v712_v24 = vld [vmem:[%s1220_s22 + $0x50] sm:$0xf]  ;;  %v815_v25 = vld [vmem:[%s1220_s22 + $0x54] sm:$0xf0] }
  0x35   : > { %v789_v26 = vor.u32 %v832_v21, %v786_v23  ;;  %v776_v27 = vld [vmem:[%s1220_s22 + $0xd0] sm:$0xf]  ;;  %v831_v28 = vld [vmem:[%s1220_s22 + $0xd4] sm:$0xf0]  ;;  %v814_v29 = vld [vmem:[%s1220_s22 + $0x54] sm:$0xf]  ;;  %v713_v30 = vor.u32 %v815_v25, %v712_v24 }
  0x36   : > { %472 = vmatpush.bf16.msra.mxu0 %v721_v17  ;;  %v714_v31 = vld [vmem:[%s1220_s22 + $0x58] sm:$0xf0]  ;;  %v830_v32 = vld [vmem:[%s1220_s22 + $0xd4] sm:$0xf]  ;;  %v777_v34 = vor.u32 %v831_v28, %v776_v27  ;;  %v704_v36 = vld [vmem:[%s1220_s22 + $0x40] sm:$0xf] }
  0x37   : > { %v778_v33 = vld [vmem:[%s1220_s22 + $0xd8] sm:$0xf0]  ;;  %485 = vmatpush.bf16.msra.mxu1 %v785_v18  ;;  %498 = vmatpush.bf16.msra.mxu2 %v725_v22  ;;  %v717_v35 = vor.u32 %v814_v29, %v714_v31  ;;  %v813_v37 = vld [vmem:[%s1220_s22 + $0x44] sm:$0xf0]  ;;  %v768_v38 = vld [vmem:[%s1220_s22 + $0xc0] sm:$0xf] }
  0x38   : > { %511 = vmatpush.bf16.msra.mxu3 %v789_v26  ;;  %v781_v39 = vor.u32 %v830_v32, %v778_v33  ;;  %v829_v40 = vld [vmem:[%s1220_s22 + $0xc4] sm:$0xf0]  ;;  %v812_v41 = vld [vmem:[%s1220_s22 + $0x44] sm:$0xf]  ;;  %v706_v42 = vld [vmem:[%s1220_s22 + $0x48] sm:$0xf0]  ;;  %v705_v45 = vor.u32 %v813_v37, %v704_v36 }
  0x39   : > { %v828_v43 = vld [vmem:[%s1220_s22 + $0xc4] sm:$0xf]  ;;  %v770_v44 = vld [vmem:[%s1220_s22 + $0xc8] sm:$0xf0]  ;;  %v769_v46 = vor.u32 %v829_v40, %v768_v38  ;;  %v709_v47 = vor.u32 %v812_v41, %v706_v42  ;;  %v696_v48 = vld [vmem:[%s1220_s22 + $0x30] sm:$0xf] }
  0x3a   : > { %473 = vmatpush.bf16.msra.mxu0 %v713_v30  ;;  %v811_v49 = vld [vmem:[%s1220_s22 + $0x34] sm:$0xf0]  ;;  %v760_v50 = vld [vmem:[%s1220_s22 + $0xb0] sm:$0xf]  ;;  %v773_v51 = vor.u32 %v828_v43, %v770_v44  ;;  %v810_v53 = vld [vmem:[%s1220_s22 + $0x34] sm:$0xf] }
  0x3b   : > { %486 = vmatpush.bf16.msra.mxu1 %v777_v34  ;;  %499 = vmatpush.bf16.msra.mxu2 %v717_v35  ;;  %v827_v52 = vld [vmem:[%s1220_s22 + $0xb4] sm:$0xf0]  ;;  %v698_v54 = vld [vmem:[%s1220_s22 + $0x38] sm:$0xf0]  ;;  %v826_v55 = vld [vmem:[%s1220_s22 + $0xb4] sm:$0xf]  ;;  %v697_v57 = vor.u32 %v811_v49, %v696_v48 }
  0x3c   : > { %512 = vmatpush.bf16.msra.mxu3 %v781_v39  ;;  %v762_v56 = vld [vmem:[%s1220_s22 + $0xb8] sm:$0xf0]  ;;  %v761_v58 = vor.u32 %v827_v52, %v760_v50  ;;  %v701_v59 = vor.u32 %v810_v53, %v698_v54  ;;  %v688_v60 = vld [vmem:[%s1220_s22 + $0x20] sm:$0xf]  ;;  %v809_v61 = vld [vmem:[%s1220_s22 + $0x24] sm:$0xf0] }
  0x3d   : > { %v752_v62 = vld [vmem:[%s1220_s22 + $0xa0] sm:$0xf]  ;;  %v765_v63 = vor.u32 %v826_v55, %v762_v56  ;;  %v825_v0 = vld [vmem:[%s1220_s22 + $0xa4] sm:$0xf0]  ;;  %v808_v1 = vld [vmem:[%s1220_s22 + $0x24] sm:$0xf]  ;;  %v689_v5 = vor.u32 %v809_v61, %v688_v60 }
  0x3e   : > { %474 = vmatpush.bf16.msra.mxu0 %v705_v45  ;;  %v690_v2 = vld [vmem:[%s1220_s22 + $0x28] sm:$0xf0]  ;;  %v824_v3 = vld [vmem:[%s1220_s22 + $0xa4] sm:$0xf]  ;;  %v680_v6 = vld [vmem:[%s1220_s22 + $0x10] sm:$0xf]  ;;  %v753_v7 = vor.u32 %v825_v0, %v752_v62 }
  0x3f   : > { %487 = vmatpush.bf16.msra.mxu1 %v769_v46  ;;  %500 = vmatpush.bf16.msra.mxu2 %v709_v47  ;;  %v754_v4 = vld [vmem:[%s1220_s22 + $0xa8] sm:$0xf0]  ;;  %v693_v8 = vor.u32 %v808_v1, %v690_v2  ;;  %v807_v9 = vld [vmem:[%s1220_s22 + $0x14] sm:$0xf0]  ;;  %v744_v10 = vld [vmem:[%s1220_s22 + $0x90] sm:$0xf] }
  0x40   : > { %513 = vmatpush.bf16.msra.mxu3 %v773_v51  ;;  %v823_v11 = vld [vmem:[%s1220_s22 + $0x94] sm:$0xf0]  ;;  %v757_v12 = vor.u32 %v824_v3, %v754_v4  ;;  %v806_v13 = vld [vmem:[%s1220_s22 + $0x14] sm:$0xf]  ;;  %v682_v14 = vld [vmem:[%s1220_s22 + $0x18] sm:$0xf0]  ;;  %v681_v17 = vor.u32 %v807_v9, %v680_v6 }
  0x41   : > { %v822_v15 = vld [vmem:[%s1220_s22 + $0x94] sm:$0xf]  ;;  %v746_v16 = vld [vmem:[%s1220_s22 + $0x98] sm:$0xf0]  ;;  %v745_v19 = vor.u32 %v823_v11, %v744_v10  ;;  %v685_v20 = vor.u32 %v806_v13, %v682_v14  ;;  %v672_v21 = vld [vmem:[%s1220_s22] sm:$0xf] }
  0x42   : > { %475 = vmatpush.bf16.msra.mxu0 %v697_v57  ;;  %v265_v18 = vld [vmem:[#allocation2] sm:$0xff]  ;;  %v805_v22 = vld [vmem:[%s1220_s22 + $0x4] sm:$0xf0]  ;;  %v736_v23 = vld [vmem:[%s1220_s22 + $0x80] sm:$0xf]  ;;  %v749_v24 = vor.u32 %v822_v15, %v746_v16  ;;  %p532_p2 = scmp.eq.s32.totalorder %s1084_s15, 9 }
  0x43   : > { %488 = vmatpush.bf16.msra.mxu1 %v761_v58  ;;  %501 = vmatpush.bf16.msra.mxu2 %v701_v59  ;;  %v821_v25 = vld [vmem:[%s1220_s22 + $0x84] sm:$0xf0]  ;;  %v804_v26 = vld [vmem:[%s1220_s22 + $0x4] sm:$0xf]  ;;  %v674_v27 = vld [vmem:[%s1220_s22 + $0x8] sm:$0xf0]  ;;  %v305_v30 = vunpack.c.l.b16 %v265_v18  ;;  %v673_v31 = vor.u32 %v805_v22, %v672_v21  ;;  %v306_v32 = vunpack.c.h.b16 %v265_v18 }
  0x44   : > { %514 = vmatpush.bf16.msra.mxu3 %v765_v63  ;;  %v820_v28 = vld [vmem:[%s1220_s22 + $0x84] sm:$0xf]  ;;  %v738_v29 = vld [vmem:[%s1220_s22 + $0x88] sm:$0xf0]  ;;  %v737_v33 = vor.u32 %v821_v25, %v736_v23  ;;  %v677_v34 = vor.u32 %v804_v26, %v674_v27  ;;  %v298_v38 = vld [vmem:[%s231_s7] sm:$0x3] }
  0x45   : > { %v741_v35 = vor.u32 %v820_v28, %v738_v29  ;;  %v307_v36 = vpack.c.b16 %v305_v30, %v305_v30  ;;  %v308_v37 = vpack.c.b16 %v306_v32, %v306_v32  ;;  %v300_v39 = vperm.slane %v298_v38, 0  ;;  %s533_s11 = scalar_select %p532_p2, 0.05, 1.0 }
  0x46   : > { %476 = vmatpush.bf16.msra.mxu0 %v689_v5  ;;  %v301_v45 = vperm.slane %v298_v38, 1  ;;  %s1097_s19 = smov [#allocation10]   ;;  %s555_s26 = sshll.u32 %s1322_s3, 4  ;;  %s556_s26 = int_to_ptr.hbm [resolvable:$true] %s555_s26 }
  0x47   : > { %489 = vmatpush.bf16.msra.mxu1 %v753_v7  ;;  %502 = vmatpush.bf16.msra.mxu2 %v693_v8  ;;  %v534_v44 = vstv %s533_s11  ;;  %s553_s15 = sshll.u32 %s1097_s19, 4  ;;  %p862_p3 = scmp.eq.s32.totalorder %s1182_s10, 9  ;;  %s554_s15 = int_to_ptr.vmem [resolvable:$true] %s553_s15 }
  0x48   : > { %515 = vmatpush.bf16.msra.mxu3 %v757_v12 }
  0x4a   : > { %477 = vmatpush.bf16.msra.mxu0 %v681_v17 }
  0x4b   : > { %490 = vmatpush.bf16.msra.mxu1 %v745_v19  ;;  %503 = vmatpush.bf16.msra.mxu2 %v685_v20 }
  0x4c   : > { %516 = vmatpush.bf16.msra.mxu3 %v749_v24 }
  0x4e   : > { %478 = vmatpush.bf16.msra.mxu0 %v673_v31 }
  0x4f   : > { %491 = vmatpush.bf16.msra.mxu1 %v737_v33  ;;  %504 = vmatpush.bf16.msra.mxu2 %v677_v34 }
  0x50   : > { %517 = vmatpush.bf16.msra.mxu3 %v741_v35 }
  0x51   : > { %479 = vmatmul.bf16.vlgmr.msra.gmra.mxu0 %v307_v36 }
  0x52   : > { %492 = vmatmul.bf16.vlgmr.msra.gmra.mxu1 %v308_v37  ;;  %505 = vmatmul.bf16.vlgmr.msra.gmra.mxu2 %v307_v36 }
  0x53   : > { %518 = vmatmul.bf16.vlgmr.msra.gmra.mxu3 %v308_v37 }
  0xce   : > { %v480_v40 = vpop.f32.mrf.mxu0 }
  0xcf   : > { %v481_v41 = vadd.f32 %v480_v40, %v300_v39  ;;  %v493_v42 = vpop.f32.mrf.mxu1 }
  0xd1   : > { %v494_v43 = vadd.f32 %v493_v42, %v481_v41 }
  0xd3   : > { %v523_v46 = vmax.f32 %v494_v43, 0.0 }
  0xd5   : > { %v535_v47 = vmul.f32 %v534_v44, %v523_v46  ;;  %v506_v48 = vpop.f32.mrf.mxu2 }
  0xd6   : > { %v507_v49 = vadd.f32 %v506_v48, %v301_v45  ;;  %v519_v50 = vpop.f32.mrf.mxu3  ;;  %v482_v51 = vpop.f32.mrf.mxu0 }
  0xd7   : > { %537 = vst [vmem:[#allocation10] sm:$0xff] %v535_v47  ;;  %v495_v52 = vpop.f32.mrf.mxu1 }
  0xd8   : > { %v520_v53 = vadd.f32 %v519_v50, %v507_v49 }
  0xda   : > { %v524_v54 = vmax.f32 %v520_v53, 0.0 }
  0xdc   : > { %v526_v55 = vpack.c.bf16 %v524_v54, %v523_v46  ;;  %v536_v56 = vmul.f32 %v534_v44, %v524_v54 }
  0xdd   : > { %v508_v57 = vpop.f32.mrf.mxu2 }
  0xde   : > { %538 = vst [vmem:[#allocation10 + $0x8] sm:$0xff] %v536_v56  ;;  %v521_v58 = vpop.f32.mrf.mxu3 }
  0xdf   : > { %543 = vst [vmem:[#allocation2] sm:$0xff] %v526_v55  ;;  %845 = dma.vmem_to_hbm [thread:$0]  (%p862_p3), %s554_s15, 256, %s556_s26, [#allocation6]  }
  0xe0   : > { %1067 = dma.done.wait (%p862_p3), [#allocation6], 256  }
  0xe1   : > { %1069 = vsyncadd (%p862_p3), [#allocation6], 4294967040 }
  0xe2 PF: > { %s18_s17 = sadd.s32 1, %s1092_s17   ;;  %s1327_s12 = smov %s1076_s13 }
  0xe3   : > { %p15_p4 = scmp.ge.s32.totalorder %s18_s17, 12   ;;  %s1328_s13 = smov %s1080_s14 }
  0xe4   : > { %s1329_s14 = smov %s1166_s25  ;;  %s1330_s15 = smov %s1088_s16 }
  0xe5   : > { %s1331_s16 = smov %s1333_s18  ;;  %17 = sbr.rel (!%p15_p4) target bundleno = 6 (0x6), region = 95 }
  0xea   :  { %569 = vsyncpa [#allocation5], 1 }
  0xeb   :  { %571 = vsyncpa [#allocation5 + $0x1], 1 }
  0xec   :  { %572 = vsyncpa [#allocation8], 1 }
  0xed   :  { %574 = vsyncpa [#allocation8 + $0x1], 1 }
  0xee   :  { %575 = vsyncpa [#allocation6], 1 }
  0xef   :  { %577 = vsyncpa [#allocation6 + $0x1], 1 }

</bundles_post_ra>
